<compile_context>
chip_gen: v5e
topology: v5e:2x2
jax: 0.10.0
libtpu: 0.0.40
codegen_flags: <defaults>
</compile_context>

<pallas_src>
import jax
import jax.numpy as jnp
from jax.experimental import pallas as pl
from jax.experimental.pallas import tpu as pltpu


def _round_up(n, m):
    return (n + m - 1) // m * m


def _cdiv(a, b):
    return (a + b - 1) // b


def _vmem_sizes(budget_override=None):
    """Returns (vmem_limit_bytes, planning_budget_bytes), generation-aware."""
    cap = None
    try:
        cap = getattr(pltpu.get_tpu_info(), "vmem_capacity_bytes", None)
    except Exception:
        cap = None
    if not cap:
        cap = 64 * 1024 * 1024  # conservative default = v7x per-TC VMEM
    limit = max(cap - 8 * 1024 * 1024, 16 * 1024 * 1024)
    budget = max(cap - 16 * 1024 * 1024, 12 * 1024 * 1024)
    if budget_override is not None:
        budget = int(budget_override)
        limit = min(max(limit, budget + 4 * 1024 * 1024), cap)
    return limit, budget


def _mlp_kernel(x_ref, w1_ref, b1_ref, w2_ref, b2_ref, o_ref, acc_ref):
    """grid = (batch tiles ["parallel"], K tiles over input dim I ["arbitrary"])."""
    k = pl.program_id(1)

    @pl.when(k == 0)
    def _init():
        acc_ref[...] = jnp.zeros_like(acc_ref)

    # fc1 partial product on the MXU with f32 accumulation.
    acc_ref[...] += jnp.dot(x_ref[...], w1_ref[...],
                            preferred_element_type=jnp.float32)

    @pl.when(k == pl.num_programs(1) - 1)
    def _finalize():
        h = jnp.maximum(acc_ref[...] + b1_ref[...].astype(jnp.float32), 0.0)  # ReLU (VPU)
        y = jnp.dot(h.astype(w2_ref.dtype), w2_ref[...],
                    preferred_element_type=jnp.float32)
        y = y + b2_ref[...].astype(jnp.float32)
        o_ref[...] = jax.nn.sigmoid(y).astype(o_ref.dtype)                    # sigmoid (EUP)


def prepare_mlp_params(w1, b1, w2, b2):
    """One-time parameter prep (hoisted out of the per-call forward path).

    w1: [I, H], b1: [H], w2: [H, O], b2: [O] -- weights already stored as
    [in, out] (transposed relative to torch) so the kernel computes x @ W.
    Pads the hidden / output lane dims to multiples of 128 so the fc1 result and
    the output store are lane-dense. Zero padding is inert: relu(0)=0 feeds zero
    w2 rows; padded output columns hold sigmoid(0)=0.5 and are sliced away.
    """
    I, H = w1.shape
    H2, O = w2.shape
    assert H2 == H
    Hp = _round_up(H, 128)
    Op = _round_up(O, 128)
    return dict(
        w1=jnp.pad(w1, ((0, 0), (0, Hp - H))),
        b1=jnp.pad(jnp.reshape(b1, (1, H)), ((0, 0), (0, Hp - H))),
        w2=jnp.pad(w2, ((0, Hp - H), (0, Op - O))),
        b2=jnp.pad(jnp.reshape(b2, (1, O)), ((0, 0), (0, Op - O))),
        dims=(I, H, O),
    )


def mlp_forward(x, params, *, block_m=None, vmem_budget_bytes=None, max_tk=None):
    """x: [B, I]; params: output of prepare_mlp_params. Returns [B, O] in x.dtype."""
    w1p, b1p, w2p, b2p = params["w1"], params["b1"], params["w2"], params["b2"]
    I, H, O = params["dims"]
    B, I_x = x.shape
    assert I_x == I
    Hp, Op = w1p.shape[1], w2p.shape[1]

    compute_dtype = w1p.dtype
    out_dtype = x.dtype
    if x.dtype != compute_dtype:
        # Cast the streamed operand up front (not per-tile in the kernel): with
        # bf16 weights this halves the pipelined x HBM read and tile footprint.
        x = x.astype(compute_dtype)

    vmem_limit, budget = _vmem_sizes(vmem_budget_bytes)
    w_isz = jnp.dtype(compute_dtype).itemsize
    x_isz = w_isz                      # x was cast to the compute dtype above
    out_isz = jnp.dtype(out_dtype).itemsize

    # ---- contraction (I) tiling: keep fc1 weight VMEM-resident when it fits,
    # ---- otherwise K-tile I and stream w1 chunks (needed for big I*H on v7x).
    w2_resident = (Hp * Op + Hp + Op) * w_isz            # single-buffered
    k_tiled = (I * Hp * w_isz + w2_resident) > 0.6 * budget
    if max_tk is not None:
        k_tiled = k_tiled or (max_tk < I)
    if not k_tiled:
        tk, Ip = I, I                                    # full-dim block: no I padding needed
    else:
        chunk_budget = max(int(0.35 * budget), 2 * 128 * Hp * w_isz)
        tk = max(128, (chunk_budget // (2 * Hp * w_isz)) // 128 * 128)
        if max_tk is not None:
            tk = max(128, min(tk, (max_tk // 128) * 128))
        Ip = _round_up(I, tk)
    k_steps = Ip // tk

    if Ip != I:
        # Rare corner: K-tiled path with I not a multiple of tk. Zero-pad both
        # operands so the ragged tail contributes exactly zero to the accumulator.
        # (In the K-tiled regime I is normally already 128-aligned -> no copy.)
        x = jnp.pad(x, ((0, 0), (0, Ip - I)))
        w1p = jnp.pad(w1p, ((0, Ip - I), (0, 0)))

    resident = w2_resident + (2 if k_tiled else 1) * tk * Hp * w_isz

    def footprint(tm):
        x_tiles = 2 * tm * tk * x_isz            # double-buffered x stream
        out_tiles = 2 * tm * Op * out_isz        # double-buffered output
        acc = tm * Hp * 4                        # f32 accumulator scratch
        temps = tm * (Hp + Op) * 4               # h / y epilogue temporaries
        return resident + x_tiles + out_tiles + acc + temps

    tm_cap = int(block_m) if block_m is not None else 1024
    tm = min(_round_up(min(B, tm_cap), 8), _round_up(B, 8))
    if B >= 16:
        # Keep >=2 batch steps so a v7x megacore can split the "parallel" axis.
        tm = min(tm, _round_up(_cdiv(B, 2), 8))
    while tm > 8 and footprint(tm) > budget:
        tm = max(_round_up(tm // 2, 8), 8)

    grid = (_cdiv(B, tm), k_steps)

    if k_tiled:
        w1_spec = pl.BlockSpec((tk, Hp), lambda i, k: (k, 0))        # streamed over K
    else:
        w1_spec = pl.BlockSpec((tk, Hp), lambda i, k: (0, 0),
                               pipeline_mode=pl.Buffered(1))          # VMEM-resident

    out = pl.pallas_call(
        _mlp_kernel,
        out_shape=jax.ShapeDtypeStruct((B, Op), out_dtype),
        grid=grid,
        in_specs=[
            # Streamed x tile (default 2-deep buffering; bump to pl.Buffered(3)
            # only if profiling shows the DMA exposed for large I / small H).
            pl.BlockSpec((tm, tk), lambda i, k: (i, k)),
            w1_spec,
            pl.BlockSpec((1, Hp), lambda i, k: (0, 0), pipeline_mode=pl.Buffered(1)),
            pl.BlockSpec((Hp, Op), lambda i, k: (0, 0), pipeline_mode=pl.Buffered(1)),
            pl.BlockSpec((1, Op), lambda i, k: (0, 0), pipeline_mode=pl.Buffered(1)),
        ],
        out_specs=pl.BlockSpec((tm, Op), lambda i, k: (i, 0)),
        scratch_shapes=[pltpu.VMEM((tm, Hp), jnp.float32)],
        compiler_params=pltpu.CompilerParams(
            dimension_semantics=("parallel", "arbitrary"),
            vmem_limit_bytes=int(vmem_limit),
        ),
    )(x, w1p, b1p, w2p, b2p)

    return out[:, :O]


def init_mlp_params(key, input_size, hidden_size, output_size, dtype=jnp.float32):
    """Mirrors torch nn.Linear default init U(-1/sqrt(fan_in), 1/sqrt(fan_in)).
    Weights are stored transposed relative to torch ([in, out])."""
    k1, k2, k3, k4 = jax.random.split(key, 4)
    bound1 = 1.0 / (input_size ** 0.5)
    bound2 = 1.0 / (hidden_size ** 0.5)
    w1 = jax.random.uniform(k1, (input_size, hidden_size), jnp.float32, -bound1, bound1)
    b1 = jax.random.uniform(k2, (hidden_size,), jnp.float32, -bound1, bound1)
    w2 = jax.random.uniform(k3, (hidden_size, output_size), jnp.float32, -bound2, bound2)
    b2 = jax.random.uniform(k4, (output_size,), jnp.float32, -bound2, bound2)
    return (w1.astype(dtype), b1.astype(dtype), w2.astype(dtype), b2.astype(dtype))


def mlp_reference(x, w1, b1, w2, b2):
    xf = x.astype(jnp.float32)
    h = jnp.maximum(xf @ w1.astype(jnp.float32) + b1.astype(jnp.float32), 0.0)
    y = h @ w2.astype(jnp.float32) + b2.astype(jnp.float32)
    return jax.nn.sigmoid(y).astype(x.dtype)


if __name__ == "__main__":
    key = jax.random.PRNGKey(0)
    kx, kp, kx2, kp2, kx3 = jax.random.split(key, 5)

    input_size, hidden_size, output_size = 32, 64, 16

    # --- small single-tile check (f32 params) ---
    batch = 8
    x = jax.random.normal(kx, (batch, input_size), jnp.float32)
    w1, b1, w2, b2 = init_mlp_params(kp, input_size, hidden_size, output_size)
    params = prepare_mlp_params(w1, b1, w2, b2)

    out = mlp_forward(x, params)
    jax.block_until_ready(out)
    ref = mlp_reference(x, w1, b1, w2, b2)
    assert out.shape == (batch, output_size)
    assert jnp.allclose(out, ref, atol=1e-3, rtol=1e-3)

    # --- multi-tile, ragged batch (exercises batch grid + masked tail store) ---
    batch2 = 200
    x2 = jax.random.normal(kx2, (batch2, input_size), jnp.float32)
    out2 = mlp_forward(x2, params, block_m=64)
    jax.block_until_ready(out2)
    ref2 = mlp_reference(x2, w1, b1, w2, b2)
    assert out2.shape == (batch2, output_size)
    assert jnp.allclose(out2, ref2, atol=1e-3, rtol=1e-3)

    # --- bf16 weights: x is cast to bf16 in the wrapper, f32 accumulation ---
    params_bf16 = prepare_mlp_params(w1.astype(jnp.bfloat16), b1.astype(jnp.bfloat16),
                                     w2.astype(jnp.bfloat16), b2.astype(jnp.bfloat16))
    out_bf16 = mlp_forward(x2, params_bf16, block_m=64)
    jax.block_until_ready(out_bf16)
    assert out_bf16.dtype == x2.dtype
    assert jnp.allclose(out_bf16, ref2, atol=2e-2, rtol=2e-2)

    # --- forced K-tiled (I-reduction) path: 2 K steps x 2 batch tiles ---
    in2, hid2, out2_sz = 256, 128, 16
    batch3 = 64
    w1b, b1b, w2b, b2b = init_mlp_params(kp2, in2, hid2, out2_sz)
    params_k = prepare_mlp_params(w1b, b1b, w2b, b2b)
    x3 = jax.random.normal(kx3, (batch3, in2), jnp.float32)
    out3 = mlp_forward(x3, params_k, block_m=32, max_tk=128)
    jax.block_until_ready(out3)
    ref3 = mlp_reference(x3, w1b, b1b, w2b, b2b)
    assert out3.shape == (batch3, out2_sz)
    assert jnp.allclose(out3, ref3, atol=1e-3, rtol=1e-3)

    print("KERNEL_OK")
</pallas_src>

<mosaic_0001>
module attributes {stable_mosaic.version = 11 : i64} {
  func.func @_mlp_kernel(%arg0: i32, %arg1: i32, %arg2: memref<8x32xf32, #tpu.memory_space<vmem>>, %arg3: memref<32x128xf32, #tpu.memory_space<vmem>>, %arg4: memref<1x128xf32, #tpu.memory_space<vmem>>, %arg5: memref<128x128xf32, #tpu.memory_space<vmem>>, %arg6: memref<1x128xf32, #tpu.memory_space<vmem>>, %arg7: memref<8x128xf32, #tpu.memory_space<vmem>>, %arg8: memref<8x128xf32, #tpu.memory_space<vmem>>) attributes {dimension_semantics = [#tpu.dimension_semantics<parallel>, #tpu.dimension_semantics<arbitrary>], iteration_bounds = array<i64: 1, 1>, scalar_prefetch = 0 : i64, scratch_operands = 1 : i64, tpu.core_type = #tpu.core_type<tc>, window_params = [{transform_indices = @transform_0, window_bounds = array<i64: 8, 32>}, {pipeline_mode = #tpu.pipeline_mode<synchronous>, transform_indices = @transform_1, window_bounds = array<i64: 32, 128>}, {pipeline_mode = #tpu.pipeline_mode<synchronous>, transform_indices = @transform_2, window_bounds = array<i64: 1, 128>}, {pipeline_mode = #tpu.pipeline_mode<synchronous>, transform_indices = @transform_3, window_bounds = array<i64: 128, 128>}, {pipeline_mode = #tpu.pipeline_mode<synchronous>, transform_indices = @transform_4, window_bounds = array<i64: 1, 128>}, {transform_indices = @transform_5, window_bounds = array<i64: 8, 128>}]} {
    %c0_i32 = arith.constant 0 : i32
    %0 = arith.cmpi eq, %arg1, %c0_i32 : i32
    %1 = arith.extui %0 : i1 to i32
    %c0_i32_0 = arith.constant 0 : i32
    %2 = arith.cmpi ne, %1, %c0_i32_0 : i32
    scf.if %2 {
      %cst_10 = arith.constant 0.000000e+00 : f32
      %12 = vector.broadcast %cst_10 : f32 to vector<8x128xf32>
      %c0_11 = arith.constant 0 : index
      %c0_12 = arith.constant 0 : index
      %13 = vector.load %arg8[%c0_11, %c0_12] : memref<8x128xf32, #tpu.memory_space<vmem>>, vector<8x128xf32>
      tpu.vector_store %arg8[%c0_11, %c0_12], %12 {strides = array<i32>} : memref<8x128xf32, #tpu.memory_space<vmem>>, vector<8x128xf32>,
    } else {
    }
    %c0 = arith.constant 0 : index
    %c0_1 = arith.constant 0 : index
    %3 = vector.load %arg8[%c0, %c0_1] : memref<8x128xf32, #tpu.memory_space<vmem>>, vector<8x128xf32>
    %c0_2 = arith.constant 0 : index
    %c0_3 = arith.constant 0 : index
    %4 = vector.load %arg2[%c0_2, %c0_3] : memref<8x32xf32, #tpu.memory_space<vmem>>, vector<8x32xf32>
    %c0_4 = arith.constant 0 : index
    %c0_5 = arith.constant 0 : index
    %5 = vector.load %arg3[%c0_4, %c0_5] : memref<32x128xf32, #tpu.memory_space<vmem>>, vector<32x128xf32>
    %cst = arith.constant dense<0.000000e+00> : vector<8x128xf32>
    %6 = tpu.matmul %4, %5, %cst {dimension_numbers = #tpu.dot_dimension_numbers<[1], [0], [0], [1], [0, 0, 1, 1], [], []>} : vector<8x32xf32>, vector<32x128xf32>, vector<8x128xf32> -> vector<8x128xf32>
    %7 = arith.addf %3, %6 : vector<8x128xf32>
    %c0_6 = arith.constant 0 : index
    %c0_7 = arith.constant 0 : index
    %8 = vector.load %arg8[%c0_6, %c0_7] : memref<8x128xf32, #tpu.memory_space<vmem>>, vector<8x128xf32>
    tpu.vector_store %arg8[%c0_6, %c0_7], %7 {strides = array<i32>} : memref<8x128xf32, #tpu.memory_space<vmem>>, vector<8x128xf32>,
    %c0_i32_8 = arith.constant 0 : i32
    %9 = arith.cmpi eq, %arg1, %c0_i32_8 : i32
    %10 = arith.extui %9 : i1 to i32
    %c0_i32_9 = arith.constant 0 : i32
    %11 = arith.cmpi ne, %10, %c0_i32_9 : i32
    scf.if %11 {
      %c0_10 = arith.constant 0 : index
      %c0_11 = arith.constant 0 : index
      %12 = vector.load %arg8[%c0_10, %c0_11] : memref<8x128xf32, #tpu.memory_space<vmem>>, vector<8x128xf32>
      %c0_12 = arith.constant 0 : index
      %c0_13 = arith.constant 0 : index
      %13 = vector.load %arg4[%c0_12, %c0_13] : memref<1x128xf32, #tpu.memory_space<vmem>>, vector<1x128xf32>
      %14 = vector.broadcast %13 : vector<1x128xf32> to vector<8x128xf32>
      %15 = arith.addf %12, %14 : vector<8x128xf32>
      %cst_14 = arith.constant 0.000000e+00 : f32
      %16 = vector.broadcast %cst_14 : f32 to vector<8x128xf32>
      %17 = arith.maximumf %15, %16 : vector<8x128xf32>
      %c0_15 = arith.constant 0 : index
      %c0_16 = arith.constant 0 : index
      %18 = vector.load %arg5[%c0_15, %c0_16] : memref<128x128xf32, #tpu.memory_space<vmem>>, vector<128x128xf32>
      %cst_17 = arith.constant dense<0.000000e+00> : vector<8x128xf32>
      %19 = tpu.matmul %17, %18, %cst_17 {dimension_numbers = #tpu.dot_dimension_numbers<[1], [0], [0], [1], [0, 0, 1, 1], [], []>} : vector<8x128xf32>, vector<128x128xf32>, vector<8x128xf32> -> vector<8x128xf32>
      %c0_18 = arith.constant 0 : index
      %c0_19 = arith.constant 0 : index
      %20 = vector.load %arg6[%c0_18, %c0_19] : memref<1x128xf32, #tpu.memory_space<vmem>>, vector<1x128xf32>
      %21 = vector.broadcast %20 : vector<1x128xf32> to vector<8x128xf32>
      %22 = arith.addf %19, %21 : vector<8x128xf32>
      %23 = arith.negf %22 : vector<8x128xf32>
      %24 = math.exp %23 : vector<8x128xf32>
      %cst_20 = arith.constant 1.000000e+00 : f32
      %25 = vector.broadcast %cst_20 : f32 to vector<8x128xf32>
      %26 = arith.addf %25, %24 : vector<8x128xf32>
      %27 = arith.divf %25, %26 : vector<8x128xf32>
      %c0_21 = arith.constant 0 : index
      %c0_22 = arith.constant 0 : index
      %28 = vector.load %arg7[%c0_21, %c0_22] : memref<8x128xf32, #tpu.memory_space<vmem>>, vector<8x128xf32>
      tpu.vector_store %arg7[%c0_21, %c0_22], %27 {strides = array<i32>} : memref<8x128xf32, #tpu.memory_space<vmem>>, vector<8x128xf32>,
    } else {
    }
    return
  }
  func.func @transform_0(%arg0: i32, %arg1: i32) -> (i32, i32) {
    %c0_i32 = arith.constant 0 : i32
    return %arg0, %arg1 : i32, i32
  }
  func.func @transform_1(%arg0: i32, %arg1: i32) -> (i32, i32) {
    %c0_i32 = arith.constant 0 : i32
    %c0_i32_0 = arith.constant 0 : i32
    %c0_i32_1 = arith.constant 0 : i32
    return %c0_i32, %c0_i32_0 : i32, i32
  }
  func.func @transform_2(%arg0: i32, %arg1: i32) -> (i32, i32) {
    %c0_i32 = arith.constant 0 : i32
    %c0_i32_0 = arith.constant 0 : i32
    %c0_i32_1 = arith.constant 0 : i32
    return %c0_i32, %c0_i32_0 : i32, i32
  }
  func.func @transform_3(%arg0: i32, %arg1: i32) -> (i32, i32) {
    %c0_i32 = arith.constant 0 : i32
    %c0_i32_0 = arith.constant 0 : i32
    %c0_i32_1 = arith.constant 0 : i32
    return %c0_i32, %c0_i32_0 : i32, i32
  }
  func.func @transform_4(%arg0: i32, %arg1: i32) -> (i32, i32) {
    %c0_i32 = arith.constant 0 : i32
    %c0_i32_0 = arith.constant 0 : i32
    %c0_i32_1 = arith.constant 0 : i32
    return %c0_i32, %c0_i32_0 : i32, i32
  }
  func.func @transform_5(%arg0: i32, %arg1: i32) -> (i32, i32) {
    %c0_i32 = arith.constant 0 : i32
    %c0_i32_0 = arith.constant 0 : i32
    return %arg0, %c0_i32 : i32, i32
  }
}

</mosaic_0001>

<bundles_post_ra>
// kernel: tpu_custom_call.1
= control target key start
LH: loop header
LB: loop body
LE: loop exit
PB: predicated region body
PF: predicated region fallthrough
CT: control target
= control target key end

     0   :  { %10 = vsyncpa [#allocation4], 0  ;;  %s361_s0 = inlined_call_operand.hbm [shape: f32[8,32], index: 0, kind: input, shape index: {}]   ;;  %s362_s1 = inlined_call_operand.hbm [shape: f32[32,128], index: 1, kind: input, shape index: {}]   ;;  %s363_s2 = inlined_call_operand.vmem [shape: f32[1,128], index: 2, kind: input, shape index: {}]   ;;  %s364_s3 = inlined_call_operand.hbm [shape: f32[128,128], index: 3, kind: input, shape index: {}]   ;;  %s365_s4 = inlined_call_operand.vmem [shape: f32[1,128], index: 4, kind: input, shape index: {}]   ;;  %s366_s5 = inlined_call_operand.hbm [shape: f32[8,128], index: 5, kind: output, shape index: {}]  }
   0x1   :  { %11 = vsyncpa [#allocation7], 0  ;;  %s28_s20 = sshll.u32 %s362_s1, 4  ;;  %s29_s20 = int_to_ptr.hbm [resolvable:$true] %s28_s20 }
   0x2   :  { %12 = vsyncpa [#allocation5], 0  ;;  %s307_s21 = smov [#allocation6]   ;;  %s18_s25 = sshll.u32 %s361_s0, 4  ;;  %s19_s25 = int_to_ptr.hbm [resolvable:$true] %s18_s25 }
   0x3   :  { %s30_s22 = sshll.u32 %s307_s21, 4  ;;  %s308_s26 = smov 128   ;;  %s31_s22 = int_to_ptr.vmem [resolvable:$true] %s30_s22 }
   0x4   :  { %s309_s27 = smov 8   ;;  %s310_s28 = smov [#allocation3]  }
   0x5   :  { %36 = dma.hbm_to_vmem [thread:$0]  %s29_s20, 512, %s31_s22, [#allocation7], %s308_s26, %s308_s26, %s309_s27  }
   0x6   :  { %s20_s29 = sshll.u32 %s310_s28, 4  ;;  %s43_s7 = sshll.u32 %s364_s3, 4  ;;  %s21_s29 = int_to_ptr.vmem [resolvable:$true] %s20_s29  ;;  %s44_s7 = int_to_ptr.hbm [resolvable:$true] %s43_s7 }
   0x7   :  { %23 = dma.hbm_to_vmem [thread:$0]  %s19_s25, 128, %s21_s29, [#allocation4]  }
   0x8   :  { %s311_s1 = smov [#allocation8]  }
   0x9   :  { %s45_s8 = sshll.u32 %s311_s1, 4  ;;  %s46_s8 = int_to_ptr.vmem [resolvable:$true] %s45_s8 }
   0xa   :  { %51 = dma.hbm_to_vmem [thread:$0]  %s44_s7, 2048, %s46_s8, [#allocation7], %s308_s26, %s308_s26, %s309_s27  }
   0xb   :  { %301 = dma.done.wait [#allocation4], 128  }
   0xc   :  { %302 = vsyncadd [#allocation4], 4294967168 }
   0xd   :  { %303 = dma.done.wait [#allocation7], 2560  }
   0xe   :  { %304 = vsyncadd [#allocation7], 4294964736  ;;  %v76_v0 = vld [vmem:[#allocation6 + $0x18] sm:$0xff]  ;;  %v75_v1 = vld [vmem:[#allocation6 + $0x10] sm:$0xff]  ;;  %vm77_vm0 = vcmask 261120  }
   0xf   :  { %93 = vmatpush.msra.mxu0 %v76_v0  ;;  %v128_v2 = vld [vmem:[#allocation8 + $0x78] sm:$0xff]  ;;  %v74_v3 = vld [vmem:[#allocation6 + $0x8] sm:$0xff]  ;;  %v127_v4 = vld [vmem:[#allocation8 + $0x70] sm:$0xff] }
  0x10   :  { %133 = vmatpush.msra.mxu1 %v128_v2  ;;  %v126_v5 = vld [vmem:[#allocation8 + $0x68] sm:$0xff]  ;;  %v73_v6 = vld [vmem:[#allocation6] sm:$0xff]  ;;  %v72_v7 = vld [vmem:[#allocation3] sm:$0xff] }
  0x11   :  { %94 = vmatpush.msra.mxu0 %v75_v1  ;;  %v125_v8 = vld [vmem:[#allocation8 + $0x60] sm:$0xff]  ;;  %v124_v9 = vld [vmem:[#allocation8 + $0x58] sm:$0xff]  ;;  %v123_v10 = vld [vmem:[#allocation8 + $0x50] sm:$0xff] }
  0x12   :  { %134 = vmatpush.msra.mxu1 %v127_v4  ;;  %v122_v11 = vld [vmem:[#allocation8 + $0x48] sm:$0xff]  ;;  %v121_v12 = vld [vmem:[#allocation8 + $0x40] sm:$0xff]  ;;  %v120_v13 = vld [vmem:[#allocation8 + $0x38] sm:$0xff] }
  0x13   :  { %95 = vmatpush.msra.mxu0 %v74_v3  ;;  %v119_v14 = vld [vmem:[#allocation8 + $0x30] sm:$0xff]  ;;  %v118_v15 = vld [vmem:[#allocation8 + $0x28] sm:$0xff]  ;;  %v117_v16 = vld [vmem:[#allocation8 + $0x20] sm:$0xff] }
  0x14   :  { %135 = vmatpush.msra.mxu1 %v126_v5  ;;  %v116_v17 = vld [vmem:[#allocation8 + $0x18] sm:$0xff]  ;;  %v115_v18 = vld [vmem:[#allocation8 + $0x10] sm:$0xff]  ;;  %v114_v19 = vld [vmem:[#allocation8 + $0x8] sm:$0xff] }
  0x15   :  { %96 = vmatpush.msra.mxu0 %v73_v6  ;;  %v113_v20 = vld [vmem:[#allocation8] sm:$0xff]  ;;  %v199_v21 = vld [vmem:[%s363_s2] ss:$0 sm:$0xff]  ;;  %s312_s2 = smov [#allocation9]  }
  0x16   :  { %191 = vmatmul.msk.f32.vlgmr.msra.gmra.mxu0 %vm77_vm0, %v72_v7  ;;  %136 = vmatpush.msra.mxu1 %v125_v8  ;;  %v200_v25 = vld [vmem:[%s365_s4] ss:$0 sm:$0xff]  ;;  %s178_s11 = sshll.u32 %s312_s2, 4  ;;  %s180_s4 = sshll.u32 %s366_s5, 4  ;;  %s179_s11 = int_to_ptr.vmem [resolvable:$true] %s178_s11  ;;  %s181_s4 = int_to_ptr.hbm [resolvable:$true] %s180_s4 }
  0x18   :  { %137 = vmatpush.msra.mxu1 %v124_v9 }
  0x1a   :  { %138 = vmatpush.msra.mxu1 %v123_v10 }
  0x1c   :  { %139 = vmatpush.msra.mxu1 %v122_v11 }
  0x1e   :  { %140 = vmatpush.msra.mxu1 %v121_v12 }
  0x20   :  { %141 = vmatpush.msra.mxu1 %v120_v13 }
  0x22   :  { %142 = vmatpush.msra.mxu1 %v119_v14 }
  0x24   :  { %143 = vmatpush.msra.mxu1 %v118_v15 }
  0x26   :  { %144 = vmatpush.msra.mxu1 %v117_v16 }
  0x28   :  { %145 = vmatpush.msra.mxu1 %v116_v17 }
  0x2a   :  { %146 = vmatpush.msra.mxu1 %v115_v18 }
  0x2c   :  { %147 = vmatpush.msra.mxu1 %v114_v19 }
  0x2e   :  { %148 = vmatpush.msra.mxu1 %v113_v20 }
  0x93   :  { %v98_v22 = vpop.f32.mrf.mxu0 }
  0x94   :  { %v111_v23 = vadd.f32 %v199_v21, %v98_v22 }
  0x96   :  { %v112_v24 = vmax.f32 %v111_v23, 0.0 }
  0x98   :  { %149 = vmatmul.f32.vlgmr.msra.gmra.mxu1 %v112_v24 }
 0x115   :  { %v150_v26 = vpop.f32.mrf.mxu1 }
 0x116   :  { %v151_v27 = vadd.f32 %v200_v25, %v150_v26 }
 0x118   :  { %v192_v28 = vmul.f32 -1.442695, %v151_v27 }
 0x11a   :  { %201 = vpow2.f32 %v192_v28 }
 0x120   :  { %v202_v29 = vpop.eup %201 }
 0x121   :  { %v156_v30 = vadd.f32 1.0, %v202_v29 }
 0x123   :  { %203 = vrcp.f32 %v156_v30  ;;  %v168_v34 = vand.u32 2147483648, %v156_v30  ;;  %v166_v36 = vand.u32 2147483647, %v156_v30  ;;  %vm162_vm2 = vweird.f32 %v156_v30 }
 0x125   :  { %v169_v38 = vor.u32 1.1754944e-38, %v168_v34  ;;  %vm167_vm4 = vcmp.eq.f32.partialorder %v166_v36, 8.507059e+37 }
 0x129   :  { %v204_v31 = vpop.eup %203 }
 0x12a   :  { %v158_v32 = vmul.f32 %v204_v31, %v156_v30  ;;  %vm163_vm1 = vweird.f32 %v204_v31 }
 0x12b   :  { %vm164_vm3 = vmor %vm162_vm2, %vm163_vm1 }
 0x12c   :  { %v159_v33 = vsub.f32 1.0, %v158_v32 }
 0x12e   :  { %v160_v35 = vmul.f32 %v204_v31, %v159_v33 }
 0x130   :  { %v161_v37 = vadd.f32 %v204_v31, %v160_v35 }
 0x132   :  { %v165_v39 = vsel %vm164_vm3, %v204_v31, %v161_v37 }
 0x133   :  { %v170_v40 = vsel %vm167_vm4, %v169_v38, %v165_v39 }
 0x134   :  { %172 = vst [vmem:[#allocation9] sm:$0xff] %v170_v40 }
 0x135   :  { %183 = dma.vmem_to_hbm [thread:$0]  %s179_s11, 128, %s181_s4, [#allocation5]  }
 0x136   :  { %305 = dma.done.wait [#allocation5], 128  }
 0x137   :  { %306 = vsyncadd [#allocation5], 4294967168 }
 0x138   :  { %188 = vsyncpa [#allocation4], 1 }
 0x139   :  { %189 = vsyncpa [#allocation7], 1 }
 0x13a   :  { %190 = vsyncpa [#allocation5], 1 }

</bundles_post_ra>
